<compile_context>
chip_gen: v7x
topology: tpu7x:2x2x1
jax: 0.10.0
libtpu: 0.0.40
codegen_flags: <defaults>
</compile_context>

<pallas_src>
import jax
import jax.numpy as jnp
from jax.experimental import pallas as pl
from jax.experimental.pallas import tpu as pltpu


def _leaky(x, slope=0.01):
    return jnp.where(x > 0, x, slope * x)


def laconv_kernel(p_ref, w1_ref, b1_ref, w2_ref, b2_ref, w3_ref, b3_ref,
                  wm_ref, rep_ref, bias_ref, out_ref):
    # p_ref block: (1, n*k*k, TP) -- lanes = output positions.
    p = p_ref[0]                                                  # (nkk, TP)

    # --- attention1: conv(k,k) -> leaky -> 1x1 -> leaky -> 1x1 -> sigmoid ---
    # Weight-on-left keeps the big TP axis on lanes for every intermediate.
    s = jnp.dot(w1_ref[...], p, preferred_element_type=jnp.float32)
    s = _leaky(s + b1_ref[...])                                   # (k2, TP) f32
    s = jnp.dot(w2_ref[...], s.astype(w2_ref.dtype),
                preferred_element_type=jnp.float32)
    s = _leaky(s + b2_ref[...])
    s = jnp.dot(w3_ref[...], s.astype(w3_ref.dtype),
                preferred_element_type=jnp.float32)
    att = jax.nn.sigmoid(s + b3_ref[...])                         # (k2, TP) f32

    # Replicate attention over input channels: atw[c*k*k + j, t] = att[j, t]
    # (torch.unfold's channel-major ordering).  rep is a constant 0/1 matrix
    # (nkk, k2); doing this as an MXU matmul avoids lane/sublane tiling and
    # is exact (one 1.0 per row) and essentially free next to the main matmul.
    atw = jnp.dot(rep_ref[...], att, preferred_element_type=jnp.float32)
    atx = atw * p.astype(jnp.float32)                             # (nkk, TP) f32

    # --- main conv as matmul + per-batch bias (attention3, from wrapper) ---
    y = jnp.dot(wm_ref[...], atx.astype(wm_ref.dtype),
                preferred_element_type=jnp.float32)               # (m, TP)
    y = y + bias_ref[0]                                           # (m, 1) bcast
    out_ref[0] = y.astype(out_ref.dtype)


def _im2col(x, k, stride, padding, n_H, n_W):
    """(B, n, H, W) -> (B, n*k*k, n_H*n_W), torch.unfold ordering."""
    B, n, _, _ = x.shape
    xp = jnp.pad(x, ((0, 0), (0, 0), (padding, padding), (padding, padding)))
    cols = []
    for ki in range(k):
        for kj in range(k):
            cols.append(xp[:, :, ki:ki + stride * n_H:stride,
                           kj:kj + stride * n_W:stride])
    P = jnp.stack(cols, axis=2)                  # (B, n, k*k, n_H, n_W)
    return P.reshape(B, n * k * k, n_H * n_W)    # (B, n*k*k, L)


def _pick_tile(l_pad, batch, nkk, itemsize):
    """Largest lane tile (<=512, multiple of 128) dividing the padded length,
    bounded so the double-buffered P block stays well under scoped VMEM
    (v7x: 64 MiB/TC), preferring >= 2 total grid steps (both v7x cores)."""
    cands = [t for t in (512, 384, 256, 128)
             if l_pad % t == 0 and 2 * nkk * t * itemsize <= (8 << 20)]
    if not cands:
        cands = [128]
    return next((t for t in cands if batch * (l_pad // t) >= 2), cands[-1])


def laconv2d_forward(x, params, *, kernel_size, stride=1, padding=0,
                     compute_dtype=jnp.bfloat16):
    B, n, H, W = x.shape
    k = kernel_size
    k2 = k * k
    m = params["w_main"].shape[0]
    nkk = n * k2
    n_H = 1 + (H + 2 * padding - k) // stride
    n_W = 1 + (W + 2 * padding - k) // stride
    L = n_H * n_W

    # glue: im2col patches (shared by attention1's first conv and the main
    # conv), position-last.  Dot operands go to compute_dtype (bf16 default:
    # halves the dominant HBM stream, doubles MXU rate); accumulation is f32.
    P = _im2col(x, k, stride, padding, n_H, n_W).astype(compute_dtype)

    # glue: bias path (attention3) -- global avg pool + two 1x1 convs (tiny)
    xf = x.astype(jnp.float32)
    xavg = xf.mean(axis=(2, 3))                                  # (B, n)
    hb = _leaky(xavg @ params["w_b1"].T + params["b_b1"])
    bias = (hb @ params["w_b2"].T + params["b_b2"])[:, :, None]  # (B, m, 1)
    bias = bias.astype(jnp.float32)

    # flattened weights (weight-on-left layout, no transposes needed)
    w1 = params["w_a1"].reshape(k2, nkk).astype(compute_dtype)   # (k2, nkk)
    w2 = params["w_a2"].astype(compute_dtype)                    # (k2, k2)
    w3 = params["w_a3"].astype(compute_dtype)                    # (k2, k2)
    wm = params["w_main"].reshape(m, nkk).astype(compute_dtype)  # (m, nkk)
    b1 = params["b_a1"][:, None].astype(jnp.float32)             # (k2, 1)
    b2 = params["b_a2"][:, None].astype(jnp.float32)
    b3 = params["b_a3"][:, None].astype(jnp.float32)
    # constant 0/1 channel-replication matrix: rep[c*k2 + j, j] = 1
    rep = jnp.tile(jnp.eye(k2, dtype=jnp.float32), (n, 1))       # (nkk, k2)

    # pad the position axis to a lane-aligned multiple of the tile
    Lp = pl.cdiv(L, 128) * 128
    TP = _pick_tile(Lp, B, nkk, jnp.dtype(compute_dtype).itemsize)
    if Lp > L:
        P = jnp.pad(P, ((0, 0), (0, 0), (0, Lp - L)))
    grid = (B, Lp // TP)

    out = pl.pallas_call(
        laconv_kernel,
        out_shape=jax.ShapeDtypeStruct((B, m, Lp), jnp.float32),
        grid_spec=pltpu.PrefetchScalarGridSpec(
            num_scalar_prefetch=0,
            grid=grid,
            in_specs=[
                pl.BlockSpec((1, nkk, TP), lambda b, t: (b, 0, t)),
                pl.BlockSpec((k2, nkk), lambda b, t: (0, 0)),
                pl.BlockSpec((k2, 1), lambda b, t: (0, 0)),
                pl.BlockSpec((k2, k2), lambda b, t: (0, 0)),
                pl.BlockSpec((k2, 1), lambda b, t: (0, 0)),
                pl.BlockSpec((k2, k2), lambda b, t: (0, 0)),
                pl.BlockSpec((k2, 1), lambda b, t: (0, 0)),
                pl.BlockSpec((m, nkk), lambda b, t: (0, 0)),
                pl.BlockSpec((nkk, k2), lambda b, t: (0, 0)),
                pl.BlockSpec((1, m, 1), lambda b, t: (b, 0, 0)),
            ],
            out_specs=pl.BlockSpec((1, m, TP), lambda b, t: (b, 0, t)),
        ),
        compiler_params=pltpu.CompilerParams(
            dimension_semantics=("parallel", "parallel")),
    )(P, w1, b1, w2, b2, w3, b3, wm, rep, bias)

    # (B, m, Lp) is already NCHW-flat: drop padding, reshape -- no transpose.
    return out[:, :, :L].reshape(B, m, n_H, n_W)


def ref_forward(x, p, *, kernel_size, stride=1, padding=0):
    """Pure-JAX reference mirroring the PyTorch forward (for validation)."""
    B, n, H, W = x.shape
    k = kernel_size
    k2 = k * k
    m = p["w_main"].shape[0]
    n_H = 1 + (H + 2 * padding - k) // stride
    n_W = 1 + (W + 2 * padding - k) // stride
    L = n_H * n_W

    a = jax.lax.conv_general_dilated(
        x, p["w_a1"], (stride, stride),
        [(padding, padding), (padding, padding)],
        dimension_numbers=("NCHW", "OIHW", "NCHW"),
    ) + p["b_a1"][None, :, None, None]
    a = _leaky(a)
    a = jnp.einsum("oc,bchw->bohw", p["w_a2"], a) + p["b_a2"][None, :, None, None]
    a = _leaky(a)
    a = jnp.einsum("oc,bchw->bohw", p["w_a3"], a) + p["b_a3"][None, :, None, None]
    att = jax.nn.sigmoid(a).reshape(B, k2, L)                    # (B, k2, L)

    atw = jnp.tile(att, (1, n, 1))                               # (B, n*k*k, L)
    P = _im2col(x, k, stride, padding, n_H, n_W)                 # (B, n*k*k, L)
    atx = atw * P
    w = p["w_main"].reshape(m, n * k2)
    y = jnp.einsum("mf,bfl->bml", w, atx)                        # (B, m, L)

    xavg = x.mean(axis=(2, 3))
    hb = _leaky(xavg @ p["w_b1"].T + p["b_b1"])
    bias = hb @ p["w_b2"].T + p["b_b2"]
    y = y + bias[:, :, None]
    return y.reshape(B, m, n_H, n_W)


def init_params(key, in_planes, out_planes, kernel_size):
    n, m, k = in_planes, out_planes, kernel_size
    k2 = k * k
    ks = jax.random.split(key, 12)
    f = lambda kk, shape: 0.1 * jax.random.normal(kk, shape, dtype=jnp.float32)
    return {
        # attention1: Conv(n->k2, kxk), Conv(k2->k2, 1x1), Conv(k2->k2, 1x1)
        "w_a1": f(ks[0], (k2, n, k, k)), "b_a1": f(ks[1], (k2,)),
        "w_a2": f(ks[2], (k2, k2)),       "b_a2": f(ks[3], (k2,)),
        "w_a3": f(ks[4], (k2, k2)),       "b_a3": f(ks[5], (k2,)),
        # main conv weight (bias-free, as in the module)
        "w_main": f(ks[6], (m, n, k, k)),
        # attention3 (bias path): Conv(n->m, 1x1), Conv(m->m, 1x1)
        "w_b1": f(ks[7], (m, n)), "b_b1": f(ks[8], (m,)),
        "w_b2": f(ks[9], (m, m)), "b_b2": f(ks[10], (m,)),
    }


if __name__ == "__main__":
    B, IN_PLANES, OUT_PLANES = 2, 4, 8
    H = W = 16
    K, STRIDE, PAD = 3, 1, 1

    key = jax.random.PRNGKey(0)
    kx, kp = jax.random.split(key)
    x = jax.random.normal(kx, (B, IN_PLANES, H, W), dtype=jnp.float32)
    params = init_params(kp, IN_PLANES, OUT_PLANES, K)

    y_ref = jax.block_until_ready(
        ref_forward(x, params, kernel_size=K, stride=STRIDE, padding=PAD))

    # f32 compute mode: exact check against the pure-JAX reference.
    y32 = jax.block_until_ready(
        laconv2d_forward(x, params, kernel_size=K, stride=STRIDE, padding=PAD,
                         compute_dtype=jnp.float32))
    assert y32.shape == (B, OUT_PLANES, H, W), y32.shape
    assert jnp.allclose(y32, y_ref, atol=1e-4, rtol=1e-4), (
        float(jnp.max(jnp.abs(y32 - y_ref))))

    # bf16 dot operands (default / perf path): looser tolerance for bf16.
    ybf = jax.block_until_ready(
        laconv2d_forward(x, params, kernel_size=K, stride=STRIDE, padding=PAD))
    assert ybf.shape == (B, OUT_PLANES, H, W), ybf.shape
    assert jnp.allclose(ybf, y_ref, atol=5e-2, rtol=5e-2), (
        float(jnp.max(jnp.abs(ybf - y_ref))))

    print("KERNEL_OK")
</pallas_src>

<mosaic_0001>
module attributes {stable_mosaic.version = 11 : i64} {
  func.func @laconv_kernel(%arg0: i32, %arg1: i32, %arg2: memref<1x36x256xf32, #tpu.memory_space<vmem>>, %arg3: memref<9x36xf32, #tpu.memory_space<vmem>>, %arg4: memref<9x1xf32, #tpu.memory_space<vmem>>, %arg5: memref<9x9xf32, #tpu.memory_space<vmem>>, %arg6: memref<9x1xf32, #tpu.memory_space<vmem>>, %arg7: memref<9x9xf32, #tpu.memory_space<vmem>>, %arg8: memref<9x1xf32, #tpu.memory_space<vmem>>, %arg9: memref<8x36xf32, #tpu.memory_space<vmem>>, %arg10: memref<36x9xf32, #tpu.memory_space<vmem>>, %arg11: memref<1x8x1xf32, #tpu.memory_space<vmem>>, %arg12: memref<1x8x256xf32, #tpu.memory_space<vmem>>) attributes {dimension_semantics = [#tpu.dimension_semantics<parallel>, #tpu.dimension_semantics<parallel>], iteration_bounds = array<i64: 2, 1>, scalar_prefetch = 0 : i64, scratch_operands = 0 : i64, tpu.core_type = #tpu.core_type<tc>, window_params = [{transform_indices = @transform_0, window_bounds = array<i64: 1, 36, 256>}, {pipeline_mode = #tpu.pipeline_mode<synchronous>, transform_indices = @transform_1, window_bounds = array<i64: 9, 36>}, {pipeline_mode = #tpu.pipeline_mode<synchronous>, transform_indices = @transform_2, window_bounds = array<i64: 9, 1>}, {pipeline_mode = #tpu.pipeline_mode<synchronous>, transform_indices = @transform_3, window_bounds = array<i64: 9, 9>}, {pipeline_mode = #tpu.pipeline_mode<synchronous>, transform_indices = @transform_4, window_bounds = array<i64: 9, 1>}, {pipeline_mode = #tpu.pipeline_mode<synchronous>, transform_indices = @transform_5, window_bounds = array<i64: 9, 9>}, {pipeline_mode = #tpu.pipeline_mode<synchronous>, transform_indices = @transform_6, window_bounds = array<i64: 9, 1>}, {pipeline_mode = #tpu.pipeline_mode<synchronous>, transform_indices = @transform_7, window_bounds = array<i64: 8, 36>}, {pipeline_mode = #tpu.pipeline_mode<synchronous>, transform_indices = @transform_8, window_bounds = array<i64: 36, 9>}, {transform_indices = @transform_9, window_bounds = array<i64: 1, 8, 1>}, {transform_indices = @transform_10, window_bounds = array<i64: 1, 8, 256>}]} {
    %c0 = arith.constant 0 : index
    %c0_0 = arith.constant 0 : index
    %c0_1 = arith.constant 0 : index
    %0 = vector.load %arg2[%c0, %c0_0, %c0_1] : memref<1x36x256xf32, #tpu.memory_space<vmem>>, vector<1x36x256xf32>
    %1 = vector.shape_cast %0 : vector<1x36x256xf32> to vector<36x256xf32>
    %c0_2 = arith.constant 0 : index
    %c0_3 = arith.constant 0 : index
    %2 = vector.load %arg3[%c0_2, %c0_3] : memref<9x36xf32, #tpu.memory_space<vmem>>, vector<9x36xf32>
    %cst = arith.constant dense<0.000000e+00> : vector<9x256xf32>
    %3 = tpu.matmul %2, %1, %cst {dimension_numbers = #tpu.dot_dimension_numbers<[1], [0], [0], [1], [0, 0, 1, 1], [], []>} : vector<9x36xf32>, vector<36x256xf32>, vector<9x256xf32> -> vector<9x256xf32>
    %c0_4 = arith.constant 0 : index
    %c0_5 = arith.constant 0 : index
    %4 = vector.load %arg4[%c0_4, %c0_5] : memref<9x1xf32, #tpu.memory_space<vmem>>, vector<9x1xf32>
    %5 = vector.broadcast %4 : vector<9x1xf32> to vector<9x256xf32>
    %6 = arith.addf %3, %5 : vector<9x256xf32>
    %cst_6 = arith.constant 0.000000e+00 : f32
    %7 = vector.broadcast %cst_6 : f32 to vector<9x256xf32>
    %8 = arith.cmpf ogt, %6, %7 : vector<9x256xf32>
    %cst_7 = arith.constant 0.00999999977 : f32
    %9 = vector.broadcast %cst_7 : f32 to vector<9x256xf32>
    %10 = arith.mulf %9, %6 : vector<9x256xf32>
    %11 = arith.select %8, %6, %10 : vector<9x256xi1>, vector<9x256xf32>
    %c0_8 = arith.constant 0 : index
    %c0_9 = arith.constant 0 : index
    %12 = vector.load %arg5[%c0_8, %c0_9] : memref<9x9xf32, #tpu.memory_space<vmem>>, vector<9x9xf32>
    %cst_10 = arith.constant dense<0.000000e+00> : vector<9x256xf32>
    %13 = tpu.matmul %12, %11, %cst_10 {dimension_numbers = #tpu.dot_dimension_numbers<[1], [0], [0], [1], [0, 0, 1, 1], [], []>} : vector<9x9xf32>, vector<9x256xf32>, vector<9x256xf32> -> vector<9x256xf32>
    %c0_11 = arith.constant 0 : index
    %c0_12 = arith.constant 0 : index
    %14 = vector.load %arg6[%c0_11, %c0_12] : memref<9x1xf32, #tpu.memory_space<vmem>>, vector<9x1xf32>
    %15 = vector.broadcast %14 : vector<9x1xf32> to vector<9x256xf32>
    %16 = arith.addf %13, %15 : vector<9x256xf32>
    %cst_13 = arith.constant 0.000000e+00 : f32
    %17 = vector.broadcast %cst_13 : f32 to vector<9x256xf32>
    %18 = arith.cmpf ogt, %16, %17 : vector<9x256xf32>
    %cst_14 = arith.constant 0.00999999977 : f32
    %19 = vector.broadcast %cst_14 : f32 to vector<9x256xf32>
    %20 = arith.mulf %19, %16 : vector<9x256xf32>
    %21 = arith.select %18, %16, %20 : vector<9x256xi1>, vector<9x256xf32>
    %c0_15 = arith.constant 0 : index
    %c0_16 = arith.constant 0 : index
    %22 = vector.load %arg7[%c0_15, %c0_16] : memref<9x9xf32, #tpu.memory_space<vmem>>, vector<9x9xf32>
    %cst_17 = arith.constant dense<0.000000e+00> : vector<9x256xf32>
    %23 = tpu.matmul %22, %21, %cst_17 {dimension_numbers = #tpu.dot_dimension_numbers<[1], [0], [0], [1], [0, 0, 1, 1], [], []>} : vector<9x9xf32>, vector<9x256xf32>, vector<9x256xf32> -> vector<9x256xf32>
    %c0_18 = arith.constant 0 : index
    %c0_19 = arith.constant 0 : index
    %24 = vector.load %arg8[%c0_18, %c0_19] : memref<9x1xf32, #tpu.memory_space<vmem>>, vector<9x1xf32>
    %25 = vector.broadcast %24 : vector<9x1xf32> to vector<9x256xf32>
    %26 = arith.addf %23, %25 : vector<9x256xf32>
    %27 = arith.negf %26 : vector<9x256xf32>
    %28 = math.exp %27 : vector<9x256xf32>
    %cst_20 = arith.constant 1.000000e+00 : f32
    %29 = vector.broadcast %cst_20 : f32 to vector<9x256xf32>
    %30 = arith.addf %29, %28 : vector<9x256xf32>
    %31 = arith.divf %29, %30 : vector<9x256xf32>
    %c0_21 = arith.constant 0 : index
    %c0_22 = arith.constant 0 : index
    %32 = vector.load %arg10[%c0_21, %c0_22] : memref<36x9xf32, #tpu.memory_space<vmem>>, vector<36x9xf32>
    %cst_23 = arith.constant dense<0.000000e+00> : vector<36x256xf32>
    %33 = tpu.matmul %32, %31, %cst_23 {dimension_numbers = #tpu.dot_dimension_numbers<[1], [0], [0], [1], [0, 0, 1, 1], [], []>} : vector<36x9xf32>, vector<9x256xf32>, vector<36x256xf32> -> vector<36x256xf32>
    %34 = arith.mulf %33, %1 : vector<36x256xf32>
    %c0_24 = arith.constant 0 : index
    %c0_25 = arith.constant 0 : index
    %35 = vector.load %arg9[%c0_24, %c0_25] : memref<8x36xf32, #tpu.memory_space<vmem>>, vector<8x36xf32>
    %cst_26 = arith.constant dense<0.000000e+00> : vector<8x256xf32>
    %36 = tpu.matmul %35, %34, %cst_26 {dimension_numbers = #tpu.dot_dimension_numbers<[1], [0], [0], [1], [0, 0, 1, 1], [], []>} : vector<8x36xf32>, vector<36x256xf32>, vector<8x256xf32> -> vector<8x256xf32>
    %c0_27 = arith.constant 0 : index
    %c0_28 = arith.constant 0 : index
    %c0_29 = arith.constant 0 : index
    %37 = vector.load %arg11[%c0_27, %c0_28, %c0_29] : memref<1x8x1xf32, #tpu.memory_space<vmem>>, vector<1x8x1xf32>
    %38 = vector.shape_cast %37 : vector<1x8x1xf32> to vector<8x1xf32>
    %39 = vector.broadcast %38 : vector<8x1xf32> to vector<8x256xf32>
    %40 = arith.addf %36, %39 : vector<8x256xf32>
    %c0_30 = arith.constant 0 : index
    %c0_31 = arith.constant 0 : index
    %c0_32 = arith.constant 0 : index
    %41 = vector.load %arg12[%c0_30, %c0_31, %c0_32] : memref<1x8x256xf32, #tpu.memory_space<vmem>>, vector<1x8x256xf32>
    %42 = vector.shape_cast %41 : vector<1x8x256xf32> to vector<8x256xf32>
    %43 = vector.shape_cast %40 : vector<8x256xf32> to vector<1x8x256xf32>
    tpu.vector_store %arg12[%c0_30, %c0_31, %c0_32], %43 {strides = array<i32>} : memref<1x8x256xf32, #tpu.memory_space<vmem>>, vector<1x8x256xf32>,
    return
  }
  func.func @transform_0(%arg0: i32, %arg1: i32) -> (i32, i32, i32) {
    %c0_i32 = arith.constant 0 : i32
    %c0_i32_0 = arith.constant 0 : i32
    return %arg0, %c0_i32, %arg1 : i32, i32, i32
  }
  func.func @transform_1(%arg0: i32, %arg1: i32) -> (i32, i32) {
    %c0_i32 = arith.constant 0 : i32
    %c0_i32_0 = arith.constant 0 : i32
    %c0_i32_1 = arith.constant 0 : i32
    return %c0_i32, %c0_i32_0 : i32, i32
  }
  func.func @transform_2(%arg0: i32, %arg1: i32) -> (i32, i32) {
    %c0_i32 = arith.constant 0 : i32
    %c0_i32_0 = arith.constant 0 : i32
    %c0_i32_1 = arith.constant 0 : i32
    return %c0_i32, %c0_i32_0 : i32, i32
  }
  func.func @transform_3(%arg0: i32, %arg1: i32) -> (i32, i32) {
    %c0_i32 = arith.constant 0 : i32
    %c0_i32_0 = arith.constant 0 : i32
    %c0_i32_1 = arith.constant 0 : i32
    return %c0_i32, %c0_i32_0 : i32, i32
  }
  func.func @transform_4(%arg0: i32, %arg1: i32) -> (i32, i32) {
    %c0_i32 = arith.constant 0 : i32
    %c0_i32_0 = arith.constant 0 : i32
    %c0_i32_1 = arith.constant 0 : i32
    return %c0_i32, %c0_i32_0 : i32, i32
  }
  func.func @transform_5(%arg0: i32, %arg1: i32) -> (i32, i32) {
    %c0_i32 = arith.constant 0 : i32
    %c0_i32_0 = arith.constant 0 : i32
    %c0_i32_1 = arith.constant 0 : i32
    return %c0_i32, %c0_i32_0 : i32, i32
  }
  func.func @transform_6(%arg0: i32, %arg1: i32) -> (i32, i32) {
    %c0_i32 = arith.constant 0 : i32
    %c0_i32_0 = arith.constant 0 : i32
    %c0_i32_1 = arith.constant 0 : i32
    return %c0_i32, %c0_i32_0 : i32, i32
  }
  func.func @transform_7(%arg0: i32, %arg1: i32) -> (i32, i32) {
    %c0_i32 = arith.constant 0 : i32
    %c0_i32_0 = arith.constant 0 : i32
    %c0_i32_1 = arith.constant 0 : i32
    return %c0_i32, %c0_i32_0 : i32, i32
  }
  func.func @transform_8(%arg0: i32, %arg1: i32) -> (i32, i32) {
    %c0_i32 = arith.constant 0 : i32
    %c0_i32_0 = arith.constant 0 : i32
    %c0_i32_1 = arith.constant 0 : i32
    return %c0_i32, %c0_i32_0 : i32, i32
  }
  func.func @transform_9(%arg0: i32, %arg1: i32) -> (i32, i32, i32) {
    %c0_i32 = arith.constant 0 : i32
    %c0_i32_0 = arith.constant 0 : i32
    %c0_i32_1 = arith.constant 0 : i32
    return %arg0, %c0_i32, %c0_i32_0 : i32, i32, i32
  }
  func.func @transform_10(%arg0: i32, %arg1: i32) -> (i32, i32, i32) {
    %c0_i32 = arith.constant 0 : i32
    %c0_i32_0 = arith.constant 0 : i32
    return %arg0, %c0_i32, %arg1 : i32, i32, i32
  }
}

</mosaic_0001>

<bundles_post_ra>
// kernel: tpu_custom_call.1
= control target key start
LH: loop header
LB: loop body
LE: loop exit
PB: predicated region body
PF: predicated region fallthrough
CT: control target
= control target key end

     0   :  { %s1668_s0 = inlined_call_operand.vmem [shape: f32[2,36,256], index: 0, kind: input, shape index: {}]   ;;  %s1669_s1 = inlined_call_operand.vmem [shape: f32[9,36], index: 1, kind: input, shape index: {}]   ;;  %s1670_s2 = inlined_call_operand.vmem [shape: f32[9,1], index: 2, kind: input, shape index: {}]   ;;  %s1671_s3 = inlined_call_operand.vmem [shape: f32[9,9], index: 3, kind: input, shape index: {}]   ;;  %s1672_s4 = inlined_call_operand.vmem [shape: f32[9,1], index: 4, kind: input, shape index: {}]   ;;  %s1673_s5 = inlined_call_operand.vmem [shape: f32[9,9], index: 5, kind: input, shape index: {}]   ;;  %s1674_s6 = inlined_call_operand.vmem [shape: f32[9,1], index: 6, kind: input, shape index: {}]   ;;  %s1675_s7 = inlined_call_operand.vmem [shape: f32[8,36], index: 7, kind: input, shape index: {}]   ;;  %s1676_s8 = inlined_call_operand.vmem [shape: f32[36,9], index: 8, kind: input, shape index: {}]   ;;  %s1677_s9 = inlined_call_operand.vmem [shape: f32[2,8,1], index: 9, kind: input, shape index: {}]   ;;  %s1678_s10 = inlined_call_operand.hbm [shape: f32[2,8,256], index: 10, kind: output, shape index: {}]  }
   0x1   :  { %1679 = sst [smem:[#allocation5_spill]] %s1668_s0 }
   0x2   :  { %15 = vsyncpa [#allocation3], 0 }
   0x3   :  { %17 = vsyncpa [#allocation3 + $0x1], 0  ;;  %s1398_s13 = smov 0   ;;  %s1400_s14 = smov 0  }
   0x4   :  { %s1402_s15 = smov 0   ;;  %s1404_s16 = smov 0  }
   0x5   :  { %s1406_s17 = smov 0   ;;  %s1408_s18 = smov 0  }
   0x6 LB: > { %s1102_s19 = sadd.s32 4294967295, %s1337_s18   ;;  %s1103_s20 = sadd.s32 4294967294, %s1337_s18   ;;  %s1337_s18 = sphi %s1408_s18, %s23_s18   ;;  %s1333_s17 = sphi %s1406_s17, %s1689_s17   ;;  %s1329_s16 = sphi %s1404_s16, %s1688_s16   ;;  %s1325_s15 = sphi %s1402_s15, %s1687_s15   ;;  %s1321_s14 = sphi %s1400_s14, %s1686_s14   ;;  %s1317_s13 = sphi %s1398_s13, %s1685_s13  }
   0x7   : > { %s35_s21 = sadd.s32 1, %s1333_s17  ;;  %s266_s22 = sadd.s32 1, %s1325_s15 }
   0x8   : > { %p37_p0 = scmp.ge.s32.totalorder %s35_s21, 2  ;;  %p276_p1 = scmp.ne.s32.totalorder %s1325_s15, %s1321_s14 }
   0x9   : > { %p277_p2 = scmp.eq.s32.totalorder %s1102_s19, 1  ;;  %p282_p3 = scmp.ne.s32.totalorder %s1321_s14, %s1317_s13 }
   0xa   : > { %s1691_s21 = smov (%p37_p0, %s35_s21), 0  ;;  %p283_p5 = scmp.eq.s32.totalorder %s1103_s20, 1 }
   0xb   : > { %p1438_p4 = por %p277_p2, %p276_p1  ;;  %s261_s24 = ssub.s32 %s1333_s17, %s1691_s21 }
   0xc   : > { %p1106_p6 = scmp.ge.s32.totalorder %s1337_s18, 1  ;;  %p264_p7 = scmp.eq.s32.totalorder %s261_s24, 0 }
   0xd   : > { %p1445_p8 = por %p283_p5, %p282_p3  ;;  %p345_p9 = scmp.lt.s32.totalorder %s1337_s18, 3 }
   0xe   : > { %s1451_s26 = scalar_select %p264_p7, %s1325_s15, %s266_s22  }
   0xf   : > { %p346_p10 = pnand %p1106_p6, %p345_p9 }
  0x10   : > { %p392_p11 = scmp.lt.s32.totalorder (!%p346_p10), %s1329_s16, 1  ;;  %v1339_v0 = vmov (!%p346_p10), 0.0   ;;  %v418_v1 = vld [vmem:[%s1670_s2] sm:$0xff] (!%p346_p10)  ;;  %v1340_v2 = vmov (!%p346_p10), 0   ;;  %v419_v3 = vld [vmem:[%s1670_s2 + $0x8] sm:$0x1] (!%p346_p10) }
  0x11   : > { %349 = sbr.rel (%p346_p10) target bundleno = 1209 (0x4b9), region = 60  ;;  %508 = vmatprep.mubr.f32.mxu0 (!%p346_p10), %v1339_v0  ;;  %514 = vmatprep.mubr.f32.mxu1 (!%p346_p10), %v1339_v0  ;;  %s1682_s0 = sld [smem:[#allocation5_spill]] (!%p346_p10)  ;;  %v652_v15 = vld [vmem:[%s1674_s6] sm:$0xff] (!%p346_p10)  ;;  %vm437_vm0 = vcmask (!%p346_p10), 1043456   ;;  %vm430_vm1 = vcmask (!%p346_p10), 293888   ;;  %vm554_vm2 = vcmask (!%p346_p10), 1040384  }
  0x12   : > { %1241 = vset.pattern.permute.xlu0 (!%p346_p10), %v1340_v2  ;;  %1242 = vset.pattern.permute.xlu1 (!%p346_p10), %v1340_v2  ;;  %v416_v20 = vld [vmem:[%s1669_s1] sm:$0xff] (!%p346_p10)  ;;  %v417_v21 = vld [vmem:[%s1669_s1 + $0x8] sm:$0x1] (!%p346_p10)  ;;  %vm1341_vm7 = vmmov (!%p346_p10), 1   ;;  %vm547_vm9 = vcmask (!%p346_p10), 72704   ;;  %v779_v44 = vld [vmem:[%s1676_s8 + $0x10] sm:$0xff] (!%p346_p10) }
  0x13   : > { %422 = vperm.xlu0 (!%p346_p10), %1241, %v418_v1   ;;  %v535_v22 = vld [vmem:[%s1672_s4] sm:$0xff] (!%p346_p10)  ;;  %v536_v23 = vld [vmem:[%s1672_s4 + $0x8] sm:$0x1] (!%p346_p10)  ;;  %vm1540_vm8 = vmpackc.low (!%p346_p10), %vm554_vm2, %vm1341_vm7  ;;  %s388_s12 = sand.u32 (!%p346_p10), 1, %s1321_s14   ;;  %s1141_s20 = sshll.u32 (!%p346_p10), %s1329_s16, 8 }
  0x14   : > { %539 = vperm.xlu1 (!%p346_p10), %1242, %v535_v22   ;;  %v653_v24 = vld [vmem:[%s1674_s6 + $0x8] sm:$0x1] (!%p346_p10)  ;;  %v533_v46 = vld [vmem:[%s1671_s3] sm:$0xff] (!%p346_p10)  ;;  %s1107_s19 = sshll.u32 (!%p346_p10), %s388_s12, 4 }
  0x15   : > { %v534_v47 = vld [vmem:[%s1671_s3 + $0x8] sm:$0x1] (!%p346_p10) }
  0x17   : > { %427 = vperm.xlu0 (!%p346_p10), %1241, %v419_v3  }
  0x18   : > { %s393_s29 = scalar_select %p392_p11, %s1329_s16, 1  ;;  %544 = vperm.xlu1 %1242, %v536_v23  }
  0x19   : > { %s998_s16 = scalar_lea.sflag [#allocation3], %s388_s12 }
  0x1a   : > { %s1182_s30 = smul.u32 80, %s393_s29  ;;  %s1109_s24 = sshll.u32 %s393_s29, 3 }
  0x1b   : > { %s404_s11 = scalar_lea.vmem %s1677_s9, %s1109_s24  ;;  %656 = vperm.xlu0 %1241, %v652_v15   ;;  %s390_s24 = scalar_lea.vmem [#allocation2], %s1107_s19 }
  0x1c   : > { %s1466_s22 = scalar_lea.vmem %s1682_s0, %s1182_s30  ;;  %v909_v18 = vld [vmem:[%s404_s11] sm:$0xff]  ;;  %661 = vperm.xlu1 %1242, %v653_v24   ;;  %s1621_s29 = scalar_lea.hbm %s1678_s10, %s1141_s20 }
  0x1d   : > { %v1469_v4 = vld [vmem:[%s1466_s22 + $0x8] sm:$0xff]  ;;  %v1472_v5 = vld [vmem:[%s1466_s22 + $0x18] sm:$0xff]  ;;  %v1475_v6 = vld [vmem:[%s1466_s22] sm:$0xff]  ;;  %s1342_s11 = smov [#allocation2]  }
  0x1e   : > { %v1142_v7 = vpack.c.bf16 %v1472_v5, %v1469_v4  ;;  %v1480_v8 = vld [vmem:[%s1466_s22 + $0x10] sm:$0xff]  ;;  %v1483_v9 = vld [vmem:[%s1466_s22 + $0x28] sm:$0xff]  ;;  %v1486_v10 = vld [vmem:[%s1466_s22 + $0x38] sm:$0xff]  ;;  %s1263_s19 = sshll.u32 %s1342_s11, 4  ;;  %s1264_s19 = int_to_ptr.vmem [resolvable:$false] %s1263_s19 }
  0x1f   : > { %v1144_v11 = vpack.c.bf16 %v1480_v8, %v1475_v6  ;;  %v1146_v12 = vpack.c.bf16 %v1486_v10, %v1483_v9  ;;  %v1493_v13 = vld [vmem:[%s1466_s22 + $0x20] sm:$0xff]  ;;  %v1496_v14 = vld [vmem:[%s1466_s22 + $0x30] sm:$0xff]  ;;  %v1507_v17 = vld [vmem:[%s1466_s22 + $0x48] sm:$0xf]  ;;  %912 = vperm.xlu0 %1241, %v909_v18   ;;  %s1265_s0 = scalar_lea.vmem %s1264_s19, 512 }
  0x20   : > { %1143 = vmatprep.subr.bf16.mxu0 %v1142_v7  ;;  %1176 = vmatprep.subr.bf16.mxu1 %v1142_v7  ;;  %v1148_v16 = vpack.c.bf16 %v1496_v14, %v1493_v13  ;;  %v1514_v19 = vld [vmem:[%s1466_s22 + $0x40] sm:$0xf]  ;;  %s1014_s22 = sshll.u32 %s390_s24, 4  ;;  %s1623_s22 = int_to_ptr.vmem [resolvable:$true] %s1014_s22 }
  0x21   : > { %1145 = vmatpush1.bf16.msra.mxu0 %v1144_v11  ;;  %1179 = vmatpush1.bf16.msra.mxu1 %v1144_v11  ;;  %v650_v11 = vld [vmem:[%s1673_s5] sm:$0xff]  ;;  %s1259_s30 = scalar_lea.vmem %s1623_s22, 256  ;;  %p1266_p1 = scmp.lt.s32.totalorder %s1623_s22, %s1264_s19 }
  0x22   : > { %1147 = vmatprep.subr.bf16.mxu0 %v1146_v12  ;;  %1177 = vmatprep.subr.bf16.mxu1 %v1146_v12  ;;  %v651_v12 = vld [vmem:[%s1673_s5 + $0x8] sm:$0x1]  ;;  %p1260_p12 = scmp.ne.s32.totalorder %s1623_s22, %s1259_s30  ;;  %p1267_p2 = scmp.lt.s32.totalorder %s1265_s0, %s1259_s30 }
  0x24   : > { %p1261_p13 = pnand %p1260_p12, %p1438_p4  ;;  %p1268_p3 = por %p1267_p2, %p1266_p1 }
  0x25   : > { %1149 = vmatpush1.bf16.msra.mxu0 %v1148_v16  ;;  %1180 = vmatpush1.bf16.msra.mxu1 %v1148_v16 }
  0x26   : > { %1110 = vmatprep.subr.msk.mxu0 %vm437_vm0, %v1507_v17  ;;  %1178 = vmatprep.subr.msk.mxu1 %vm437_vm0, %v1507_v17  ;;  %p1262_p0 = pneg %p1261_p13 }
  0x28   : > { %p1269_p5 = pnand %p1268_p3, %p1262_p0 }
  0x29   : > { %1111 = vmatpush1.msk.msra.mxu0 %vm437_vm0, %v1514_v19  ;;  %1181 = vmatpush1.msk.msra.mxu1 %vm437_vm0, %v1514_v19 }
  0x2a   : > { %1112 = vmatmul.mubr.msk.f32.vlgmr.msra.gmra.mrb[0].mxu0 %vm430_vm1, %v416_v20  ;;  %1113 = vmatmul.mubr.msk.f32.vlgmr.msra.gmra.mrb[0].mxu1 %vm430_vm1, %v417_v21 }
  0x2b   : > { %625 = vmatprep.mubr.f32.mxu1 %v1339_v0  ;;  %867 = vmatprep.mubr.f32.mxu0 %v1339_v0 }
  0x92   : > { %v423_v25 = vpop.permute.xlu0 %422 }
  0x93   : > { %v540_v48 = vpop.permute.xlu1 %539 }
  0x96   : > { %v428_v26 = vpop.permute.xlu0 %427 }
  0x97   : > { %v545_v53 = vpop.permute.xlu1 %544 }
  0x9a   : > { %v657_v15 = vpop.permute.xlu0 %656 }
  0x9b   : > { %v662_v23 = vpop.permute.xlu1 %661 }
  0xfd   : > { %v510_v27 = vpop.f32.mrb[0].mxu0  ;;  %v516_v28 = vpop.f32.mrb[0].mxu1 }
  0xfe   : > { %v511_v29 = vadd.f32 %v510_v27, %v423_v25  ;;  %v517_v30 = vadd.f32 %v516_v28, %v428_v26  ;;  %v512_v31 = vpop.f32.mrb[1].mxu0  ;;  %v518_v32 = vpop.f32.mrb[1].mxu1 }
  0xff   : > { %v513_v33 = vadd.f32 %v512_v31, %v423_v25  ;;  %v519_v34 = vadd.f32 %v518_v32, %v428_v26 }
 0x100   : > { %vm521_vm3 = vcmp.gt.f32.partialorder %v511_v29, 0.0  ;;  %v525_v35 = vmul.f32 0.01, %v511_v29  ;;  %vm523_vm4 = vcmp.gt.f32.partialorder %v517_v30, 0.0  ;;  %v527_v36 = vmul.f32 0.01, %v517_v30 }
 0x101   : > { %vm522_vm5 = vcmp.gt.f32.partialorder %v513_v33, 0.0  ;;  %v526_v37 = vmul.f32 0.01, %v513_v33  ;;  %vm524_vm6 = vcmp.gt.f32.partialorder %v519_v34, 0.0  ;;  %v528_v38 = vmul.f32 0.01, %v519_v34 }
 0x102   : > { %v529_v39 = vsel %vm521_vm3, %v511_v29, %v525_v35  ;;  %v531_v40 = vsel %vm523_vm4, %v517_v30, %v527_v36 }
 0x103   : > { %v1153_v41 = vpack.c.bf16 %v531_v40, %v529_v39  ;;  %v530_v42 = vsel %vm522_vm5, %v513_v33, %v526_v37  ;;  %v532_v43 = vsel %vm524_vm6, %v519_v34, %v528_v38 }
 0x104   : > { %v1150_v45 = vpack.c.bf16 %v532_v43, %v530_v42 }
 0x106   : > { %1152 = vmatprep.subr.msk.bf16.mxu1 %vm1540_vm8, %v1150_v45 }
 0x107   : > { %1155 = vmatpush1.bf16.msk.msra.mxu1 %vm1540_vm8, %v1153_v41 }
 0x10a   : > { %1116 = vmatmul.mubr.msk.f32.vlgmr.msra.gmra.mrb[2].mxu1 %vm547_vm9, %v533_v46  ;;  %v777_v46 = vld [vmem:[%s1676_s8] sm:$0xff] }
 0x10b   : > { %631 = vmatprep.mubr.f32.mxu1 %v1339_v0 }
 0x10e   : > { %1117 = vmatmul.mubr.msk.f32.gmra.mrb[4].mxu1 %vm547_vm9, %v534_v47  ;;  %v778_v47 = vld [vmem:[%s1676_s8 + $0x8] sm:$0xff] }
 0x10f   : > { %740 = vmatprep.mubr.f32.mxu1 %v1339_v0 }
 0x1dd   : > { %v627_v49 = vpop.f32.mrb[2].mxu1 }
 0x1de   : > { %v628_v50 = vadd.f32 %v627_v49, %v540_v48  ;;  %v629_v51 = vpop.f32.mrb[3].mxu1  ;;  %v781_v49 = vld [vmem:[%s1676_s8 + $0x20] sm:$0xf] }
 0x1df   : > { %v630_v52 = vadd.f32 %v629_v51, %v540_v48  ;;  %v780_v48 = vld [vmem:[%s1676_s8 + $0x18] sm:$0xff] }
 0x1e0   : > { %v642_v55 = vmul.f32 0.01, %v628_v50  ;;  %vm638_vm10 = vcmp.gt.f32.partialorder %v628_v50, 0.0 }
 0x1e1   : > { %v633_v54 = vpop.f32.mrb[4].mxu1  ;;  %v643_v58 = vmul.f32 0.01, %v630_v52  ;;  %vm639_vm11 = vcmp.gt.f32.partialorder %v630_v52, 0.0 }
 0x1e2   : > { %v634_v56 = vadd.f32 %v633_v54, %v545_v53  ;;  %v635_v57 = vpop.f32.mrb[5].mxu1  ;;  %v646_v62 = vsel %vm638_vm10, %v628_v50, %v642_v55 }
 0x1e3   : > { %v636_v59 = vadd.f32 %v635_v57, %v545_v53  ;;  %v647_v1 = vsel %vm639_vm11, %v630_v52, %v643_v58 }
 0x1e4   : > { %vm640_vm12 = vcmp.gt.f32.partialorder %v634_v56, 0.0  ;;  %v644_v60 = vmul.f32 0.01, %v634_v56 }
 0x1e5   : > { %vm641_vm13 = vcmp.gt.f32.partialorder %v636_v59, 0.0  ;;  %v645_v61 = vmul.f32 0.01, %v636_v59 }
 0x1e6   : > { %v648_v63 = vsel %vm640_vm12, %v634_v56, %v644_v60 }
 0x1e7   : > { %v1159_v2 = vpack.c.bf16 %v648_v63, %v646_v62  ;;  %v649_v3 = vsel %vm641_vm13, %v636_v59, %v645_v61 }
 0x1e8   : > { %v1156_v7 = vpack.c.bf16 %v649_v3, %v647_v1 }
 0x1ea   : > { %1158 = vmatprep.subr.msk.bf16.mxu1 %vm1540_vm8, %v1156_v7 }
 0x1eb   : > { %1161 = vmatpush1.bf16.msk.msra.mxu1 %vm1540_vm8, %v1159_v2 }
 0x1ee   : > { %1120 = vmatmul.mubr.msk.f32.vlgmr.msra.gmra.mrb[6].mxu1 %vm547_vm9, %v650_v11 }
 0x1ef   : > { %746 = vmatprep.mubr.f32.mxu1 %v1339_v0 }
 0x1f2   : > { %1121 = vmatmul.mubr.msk.f32.gmra.mrb[8].mxu1 %vm547_vm9, %v651_v12 }
 0x1f3   : > { %988 = vmatprep.mubr.f32.mxu1 %v1339_v0 }
 0x2c1   : > { %v742_v16 = vpop.f32.mrb[6].mxu1 }
 0x2c2   : > { %v743_v18 = vadd.f32 %v742_v16, %v657_v15  ;;  %v744_v20 = vpop.f32.mrb[7].mxu1 }
 0x2c3   : > { %v745_v21 = vadd.f32 %v744_v20, %v657_v15 }
 0x2c4   : > { %v1122_v22 = vmul.f32 -1.442695, %v743_v18 }
 0x2c5   : > { %v1123_v24 = vmul.f32 -1.442695, %v745_v21  ;;  %v748_v25 = vpop.f32.mrb[8].mxu1 }
 0x2c6   : > { %1243 = vpow2.f32 %v1122_v22  ;;  %v749_v26 = vadd.f32 %v748_v25, %v662_v23  ;;  %v750_v27 = vpop.f32.mrb[9].mxu1 }
 0x2c7   : > { %1245 = vpow2.f32 %v1123_v24  ;;  %v751_v28 = vadd.f32 %v750_v27, %v662_v23 }
 0x2c8   : > { %v1124_v29 = vmul.f32 -1.442695, %v749_v26 }
 0x2c9   : > { %v1125_v30 = vmul.f32 -1.442695, %v751_v28 }
 0x2ca   : > { %1247 = vpow2.f32 %v1124_v29 }
 0x2cb   : > { %1249 = vpow2.f32 %v1125_v30 }
 0x2d0   : > { %v1244_v31 = vpop.eup %1243 }
 0x2d1   : > { %v1246_v32 = vpop.eup %1245  ;;  %v765_v33 = vadd.f32 1.0, %v1244_v31 }
 0x2d2   : > { %v766_v34 = vadd.f32 1.0, %v1246_v32 }
 0x2d3   : > { %1251 = vrcp.f32 %v765_v33 }
 0x2d4   : > { %v1248_v35 = vpop.eup %1247  ;;  %1253 = vrcp.f32 %v766_v34 }
 0x2d5   : > { %v1250_v36 = vpop.eup %1249  ;;  %v767_v37 = vadd.f32 1.0, %v1248_v35 }
 0x2d6   : > { %v768_v38 = vadd.f32 1.0, %v1250_v36 }
 0x2d7   : > { %1255 = vrcp.f32 %v767_v37 }
 0x2d8   : > { %1257 = vrcp.f32 %v768_v38 }
 0x2dd   : > { %v1252_v39 = vpop.eup %1251 }
 0x2de   : > { %v1254_v40 = vpop.eup %1253 }
 0x2e1   : > { %v1256_v41 = vpop.eup %1255 }
 0x2e2   : > { %v1258_v42 = vpop.eup %1257  ;;  %v1165_v43 = vpack.c.bf16 %v1256_v41, %v1252_v39 }
 0x2e3   : > { %v1162_v45 = vpack.c.bf16 %v1258_v42, %v1254_v40 }
 0x2e5   : > { %1164 = vmatprep.subr.msk.bf16.mxu0 %vm1540_vm8, %v1162_v45 }
 0x2e6   : > { %1167 = vmatpush1.bf16.msk.msra.mxu0 %vm1540_vm8, %v1165_v43 }
 0x2e9   : > { %1128 = vmatmul.mubr.msk.f32.vlgmr.msra.gmra.mrb[2].mxu0 %vm547_vm9, %v777_v46 }
 0x2ea   : > { %873 = vmatprep.mubr.f32.mxu0 %v1339_v0 }
 0x2ed   : > { %1129 = vmatmul.mubr.msk.f32.gmra.mrb[4].mxu0 %vm547_vm9, %v778_v47 }
 0x2ee   : > { %879 = vmatprep.mubr.f32.mxu0 %v1339_v0 }
 0x2f1   : > { %1130 = vmatmul.mubr.msk.f32.gmra.mrb[6].mxu0 %vm547_vm9, %v779_v44 }
 0x2f2   : > { %885 = vmatprep.mubr.f32.mxu0 %v1339_v0 }
 0x2f5   : > { %1131 = vmatmul.mubr.msk.f32.gmra.mrb[8].mxu0 %vm547_vm9, %v780_v48 }
 0x2f6   : > { %891 = vmatprep.mubr.f32.mxu0 %v1339_v0 }
 0x2f9   : > { %1132 = vmatmul.mubr.msk.f32.gmra.mrb[10].mxu0 %vm547_vm9, %v781_v49 }
 0x3bc   : > { %v869_v50 = vpop.f32.mrb[2].mxu0 }
 0x3bd   : > { %v871_v51 = vpop.f32.mrb[3].mxu0  ;;  %v898_v53 = vmul.f32 %v869_v50, %v1475_v6 }
 0x3be   : > { %v899_v56 = vmul.f32 %v871_v51, %v1469_v4 }
 0x3c0   : > { %v875_v52 = vpop.f32.mrb[4].mxu0 }
 0x3c1   : > { %v900_v54 = vmul.f32 %v875_v52, %v1480_v8  ;;  %v877_v55 = vpop.f32.mrb[5].mxu0 }
 0x3c2   : > { %v901_v57 = vmul.f32 %v877_v55, %v1472_v5 }
 0x3c3   : > { %v1170_v58 = vpack.c.bf16 %v900_v54, %v898_v53 }
 0x3c4   : > { %v1168_v0 = vpack.c.bf16 %v901_v57, %v899_v56  ;;  %v881_v59 = vpop.f32.mrb[6].mxu0 }
 0x3c5   : > { %v883_v60 = vpop.f32.mrb[7].mxu0  ;;  %v902_v62 = vmul.f32 %v881_v59, %v1493_v13 }
 0x3c6   : > { %1169 = vmatprep.subr.bf16.mxu1 %v1168_v0  ;;  %v903_v8 = vmul.f32 %v883_v60, %v1483_v9  ;;  %v913_v9 = vpop.permute.xlu0 %912 }
 0x3c7   : > { %1171 = vmatpush1.bf16.msra.mxu1 %v1170_v58 }
 0x3c8   : > { %v887_v61 = vpop.f32.mrb[8].mxu0 }
 0x3c9   : > { %v904_v63 = vmul.f32 %v887_v61, %v1496_v14  ;;  %v889_v6 = vpop.f32.mrb[9].mxu0  ;;  %v908_v14 = vld [vmem:[%s1675_s7] sm:$0xff] }
 0x3ca   : > { %v905_v4 = vmul.f32 %v889_v6, %v1486_v10 }
 0x3cb   : > { %v1174_v1 = vpack.c.bf16 %v904_v63, %v902_v62 }
 0x3cc   : > { %v1172_v5 = vpack.c.bf16 %v905_v4, %v903_v8  ;;  %v893_v2 = vpop.f32.mrb[10].mxu0 }
 0x3cd   : > { %v895_v3 = vpop.f32.mrb[11].mxu0  ;;  %v906_v13 = vmul.f32 %v893_v2, %v1514_v19 }
 0x3ce   : > { %1173 = vmatprep.subr.bf16.mxu1 %v1172_v5  ;;  %v907_v7 = vmul.f32 %v895_v3, %v1507_v17 }
 0x3cf   : > { %1175 = vmatpush1.bf16.msra.mxu1 %v1174_v1 }
 0x3d0   : > { %1133 = vmatprep.subr.msk.mxu1 %vm437_vm0, %v907_v7 }
 0x3d3   : > { %1134 = vmatpush1.msk.msra.mxu1 %vm437_vm0, %v906_v13 }
 0x3d4   : > { %1135 = vmatmul.mubr.msk.f32.vlgmr.msra.gmra.mrb[10].mxu1 %vm430_vm1, %v908_v14 }
 0x4a7   : > { %v990_v10 = vpop.f32.mrb[10].mxu1 }
 0x4a8   : > { %v991_v17 = vadd.f32 %v990_v10, %v913_v9  ;;  %v992_v11 = vpop.f32.mrb[11].mxu1 }
 0x4a9   : > { %v993_v12 = vadd.f32 %v992_v11, %v913_v9 }
 0x4aa   : > { %995 = vst [vmem:[%s390_s24] sm:$0xff] %v991_v17 }
 0x4ab   : > { %996 = vst [vmem:[%s390_s24 + $0x8] sm:$0xff] %v993_v12 }
 0x4ac   : > { %1272 = shalt.err (!%p1269_p5)
}
 0x4ad   : > { %s1273_s12 = scalar_lea.hbm %s1621_s29, 256  ;;  %s1277_s27 = scalar_lea.hbm %s1678_s10, 512 }
 0x4ae   : > { %p1274_p6 = scmp.ne.s32.totalorder %s1621_s29, %s1273_s12  ;;  %p1278_p10 = scmp.lt.u32.totalorder %s1621_s29, %s1678_s10 }
 0x4af   : > { %p1279_p11 = scmp.lt.u32.totalorder %s1277_s27, %s1273_s12  ;;  %p1281_p13 = scmp.lt.u32.totalorder %s1273_s12, %s1621_s29 }
 0x4b0   : > { %p1275_p7 = pnand %p1274_p6, %p1438_p4 }
 0x4b1   : > { %p1280_p12 = por %p1279_p11, %p1278_p10 }
 0x4b2   : > { %p1276_p9 = pneg %p1275_p7 }
 0x4b3   : > { %p1282_p0 = por %p1281_p13, %p1280_p12 }
 0x4b5   : > { %p1283_p1 = pnand %p1282_p0, %p1276_p9 }
 0x4b7   : > { %1286 = shalt.err (!%p1283_p1)
}
 0x4b8   : > { %1183 = dma.vmem_to_hbm [thread:$0]  (%p1438_p4), %s1623_s22, 256, %s1621_s29, %s998_s16  }
 0x4b9 PF: > { %p1189_p2 = scmp.ge.s32.totalorder %s1337_s18, 2  ;;  %s1026_s0 = sand.u32 1, %s1317_s13  }
 0x4ba   : > { %s1027_s30 = scalar_lea.sflag [#allocation3], %s1026_s0 }
 0x4bb   : > { %p1186_p3 = pnand %p1189_p2, %p1445_p8 }
 0x4bd   : > { %1312 = dma.done.wait (!%p1186_p3), %s1027_s30, 256  }
 0x4be   : > { %1314 = vsyncadd (!%p1186_p3), %s1027_s30, 4294967040  ;;  %s23_s18 = sadd.s32 1, %s1337_s18   ;;  %s1685_s13 = smov %s1321_s14 }
 0x4bf   : > { %p20_p5 = scmp.ge.s32.totalorder %s23_s18, 4   ;;  %s1686_s14 = smov %s1325_s15 }
 0x4c0   : > { %s1687_s15 = smov %s1451_s26  ;;  %s1688_s16 = smov %s1333_s17 }
 0x4c1   : > { %s1689_s17 = smov %s1691_s21  ;;  %22 = sbr.rel (!%p20_p5) target bundleno = 6 (0x6), region = 98 }
 0x4c8   :  { %1032 = vsyncpa [#allocation3], 1 }
 0x4c9   :  { %1034 = vsyncpa [#allocation3 + $0x1], 1 }

</bundles_post_ra>
